<compile_context>
chip_gen: v7x
topology: tpu7x:2x2x1
jax: 0.10.0
libtpu: 0.0.40
codegen_flags: <defaults>
</compile_context>

<pallas_src>
import functools
import math

import jax
import jax.numpy as jnp
import numpy as np
from jax import lax
from jax.experimental import pallas as pl
from jax.experimental.pallas import tpu as pltpu

_PARTIAL_ROWS = 8     # sublane-aligned partials block per row tile
_PARTIAL_LANES = 128  # lane-dense partials block


# ---------------------------------------------------------------------------
# Generation-aware VMEM budgeting (perf feedback: v7x has 64 MiB/TC, v5e/v6e 128 MiB).
# ---------------------------------------------------------------------------
def _vmem_capacity_bytes():
    try:
        info = pltpu.get_tpu_info()
        cap = getattr(info, "vmem_capacity_bytes", None)
        if cap:
            return int(cap)
    except Exception:
        pass
    return 64 * 1024 * 1024  # conservative fallback = v7x per-TensorCore VMEM


def _kernel_a_vmem_bytes(tm, B, D, logits_itemsize):
    # Double-buffered pipeline blocks.
    blocks = 2 * (tm * D * 4                      # context row tile (f32)
                  + D * B * 4                     # resident transposed target (f32)
                  + tm * B * logits_itemsize      # logits output tile
                  + _PARTIAL_ROWS * _PARTIAL_LANES * 4
                  + tm * 4)                       # diagonal slice
    # Mosaic-materialized in-kernel temporaries (acc, z/term/prod chain, f32 logits,
    # iota/mask copies): ~5 live (tm, B) f32 arrays at peak (perf feedback).
    temps = 5 * tm * B * 4
    return blocks + temps


def _kernel_b_vmem_bytes(tm, B, logits_itemsize):
    blocks = 2 * (tm * B * logits_itemsize + _PARTIAL_ROWS * _PARTIAL_LANES * 4)
    temps = 4 * tm * B * 4  # f32 upcast, shifted, sigmoid, threshold temporaries
    return blocks + temps


def _pick_tm_logits(B, D, logits_itemsize, budget):
    """Largest row tile (multiple of 8 sublanes) dividing B that fits the budget."""
    if B % 8 != 0:
        return B  # single full-batch tile (block == full array dims is always legal)
    for tm in (1024, 512, 256, 128, 64, 32, 16, 8):
        if B % tm == 0 and _kernel_a_vmem_bytes(tm, B, D, logits_itemsize) <= budget:
            return tm
    return 8


def _pick_tm_stats(B, logits_itemsize, budget):
    """Stats-pass row tile, decoupled from Kernel A's (D-independent budget)."""
    if B % 8 != 0:
        return B
    for tm in (2048, 1024, 512, 256, 128, 64, 32, 16, 8):
        if B % tm == 0 and _kernel_b_vmem_bytes(tm, B, logits_itemsize) <= budget:
            return tm
    return 8


def _vmem_limit(est, limit_cap):
    limit = min(max(2 * est, 32 * 1024 * 1024), limit_cap)
    return int(max(limit, est + (4 << 20)))


# ---------------------------------------------------------------------------
# Kernel A: row-tiled pairwise Cauchy logits + per-tile baseline partials + diag logits.
# ---------------------------------------------------------------------------
def _pairwise_cauchy_kernel(ctx_ref, tgt_t_ref, logits_ref, part_ref, pos_ref, *,
                            scale, log_group, bf16_products):
    ctx = ctx_ref[...].astype(jnp.float32)       # (tm, D)
    tgt = tgt_t_ref[...].astype(jnp.float32)     # (D, B)  batch on lanes
    tm, D = ctx.shape
    B = tgt.shape[1]

    # Scale hoisted out of the per-dimension loop: scale both operands once per tile
    # (a no-op for the default scale == 1.0) instead of scaling every (tm, B) diff.
    if scale != 1.0:
        inv_scale = 1.0 / scale
        ctx = ctx * inv_scale
        tgt = tgt * inv_scale

    # Lane-dense (tm, B) accumulation over D (no 3-D intermediate, no XLU reduce over D),
    # seeded with the hoisted additive Cauchy constant.
    const = -(math.log(math.pi) + math.log(scale)) * D
    acc = jnp.full((tm, B), const, jnp.float32)
    # sum_d log(1+z^2) == sum_groups log(prod_group (1+z^2)) cuts EUP logs by log_group.
    # log_group=4 keeps prod(1+z^2) far from f32 overflow even for large |diff|/scale.
    for g0 in range(0, D, log_group):
        prod = None
        for d in range(g0, min(g0 + log_group, D)):
            z = tgt[d:d + 1, :] - ctx[:, d:d + 1]        # (tm, B) via broadcast
            term = 1.0 + z * z
            # TODO(synk): jnp.log(1+z^2) instead of log1p loses precision for |z| ~ 0.
            if bf16_products:                            # optional v6e/v7x VALU packing
                term = term.astype(jnp.bfloat16)
            prod = term if prod is None else prod * term
        acc = acc - jnp.log(prod.astype(jnp.float32))
    logits = acc
    logits_ref[...] = logits.astype(logits_ref.dtype)

    # Per-tile partial reductions (row-tile axis stays "parallel" — no carried state):
    #   lane 0: max of off-diagonal logits         lane 1: sum exp(off-diag - tile max)
    #   lane 2: sum of all logits                  lane 3: sum of diagonal logits
    row_off = pl.program_id(0) * tm
    r = lax.broadcasted_iota(jnp.int32, (tm, B), 0)
    c = lax.broadcasted_iota(jnp.int32, (tm, B), 1)
    diag = c == (r + row_off)
    neg_masked = jnp.where(diag, -jnp.inf, logits)
    tile_max = jnp.max(neg_masked)
    tile_sumexp = jnp.sum(jnp.exp(neg_masked - tile_max))
    tile_sum = jnp.sum(logits)
    diag_rows = jnp.sum(jnp.where(diag, logits, 0.0), axis=1, keepdims=True)  # (tm, 1)
    tile_diag_sum = jnp.sum(diag_rows)

    # Diagonal (positive) logits, rounded through the logits storage dtype so the
    # stats-pass subtraction stays consistent, stored as f32 (tiny output).
    pos_ref[...] = diag_rows.astype(logits_ref.dtype).astype(jnp.float32)

    lane = lax.broadcasted_iota(jnp.int32, (_PARTIAL_ROWS, _PARTIAL_LANES), 1)
    part_ref[...] = jnp.where(lane == 0, tile_max,
                    jnp.where(lane == 1, tile_sumexp,
                    jnp.where(lane == 2, tile_sum,
                    jnp.where(lane == 3, tile_diag_sum, 0.0))))


def _pairwise_logits_call(context, target, scale, tm, log_group, logits_dtype,
                          bf16_products, limit_cap):
    B, D = context.shape
    n_tiles = B // tm if B % tm == 0 else 1
    itemsize = jnp.dtype(logits_dtype).itemsize
    est = _kernel_a_vmem_bytes(tm, B, D, itemsize)
    kern = functools.partial(_pairwise_cauchy_kernel, scale=float(scale),
                             log_group=int(log_group), bf16_products=bool(bf16_products))
    return pl.pallas_call(
        kern,
        out_shape=(jax.ShapeDtypeStruct((B, B), logits_dtype),
                   jax.ShapeDtypeStruct((n_tiles * _PARTIAL_ROWS, _PARTIAL_LANES),
                                        jnp.float32),
                   jax.ShapeDtypeStruct((B, 1), jnp.float32)),
        grid=(n_tiles,),
        in_specs=[
            pl.BlockSpec((tm, D), lambda i: (i, 0)),   # context row tile
            # Resident transposed target (constant index_map -> fetched once).
            # TODO(synk): pipeline_mode=pl.Buffered(1) would drop its 2nd buffer on v7x.
            pl.BlockSpec((D, B), lambda i: (0, 0)),
        ],
        out_specs=[
            pl.BlockSpec((tm, B), lambda i: (i, 0)),
            pl.BlockSpec((_PARTIAL_ROWS, _PARTIAL_LANES), lambda i: (i, 0)),
            pl.BlockSpec((tm, 1), lambda i: (i, 0)),
        ],
        compiler_params=pltpu.CompilerParams(
            dimension_semantics=("parallel",),
            vmem_limit_bytes=_vmem_limit(est, limit_cap)),
    )(context, target.T)


# ---------------------------------------------------------------------------
# Kernel B: megacore-parallel streamed sigmoid / threshold partials over the logits.
# No diag masks, no exp pass, no carried accumulators; lb arrives as an SMEM scalar.
# ---------------------------------------------------------------------------
def _stats_partials_kernel(lb_ref, logits_ref, part_ref):
    lb = lb_ref[0]
    shifted = logits_ref[...].astype(jnp.float32) - lb       # (tm_b, B)
    sig_sum = jnp.sum(jax.nn.sigmoid(shifted))
    gt_sum = jnp.sum((shifted > 0.0).astype(jnp.float32))
    lane = lax.broadcasted_iota(jnp.int32, (_PARTIAL_ROWS, _PARTIAL_LANES), 1)
    part_ref[...] = jnp.where(lane == 0, sig_sum,
                    jnp.where(lane == 1, gt_sum, 0.0))


def _stats_partials_call(logits, lb, tm_b, limit_cap):
    B = logits.shape[0]
    n_tiles = B // tm_b if B % tm_b == 0 else 1
    est = _kernel_b_vmem_bytes(tm_b, B, logits.dtype.itemsize)
    return pl.pallas_call(
        _stats_partials_kernel,
        out_shape=jax.ShapeDtypeStruct((n_tiles * _PARTIAL_ROWS, _PARTIAL_LANES),
                                       jnp.float32),
        grid=(n_tiles,),
        in_specs=[
            pl.BlockSpec(memory_space=pltpu.MemorySpace.SMEM),   # log_baseline scalar
            pl.BlockSpec((tm_b, B), lambda i: (i, 0)),
        ],
        out_specs=pl.BlockSpec((_PARTIAL_ROWS, _PARTIAL_LANES), lambda i: (i, 0)),
        compiler_params=pltpu.CompilerParams(
            dimension_semantics=("parallel",),    # stateless per tile -> megacore-safe
            vmem_limit_bytes=_vmem_limit(est, limit_cap)),
    )(jnp.reshape(lb.astype(jnp.float32), (1,)), logits)


# ---------------------------------------------------------------------------
# Wrapper == LikelihoodRatioEstimator.forward (defaults; classifier metrics optional).
# ---------------------------------------------------------------------------
def likelihood_ratio_estimator(context_embedding, target_embedding, kernel_scale=1.0,
                               with_classifier_metrics=True,
                               logits_dtype=jnp.bfloat16, tm=None, tm_stats=None,
                               log_group=4, bf16_products=False):
    B, D = context_embedding.shape
    assert target_embedding.shape == (B, D)
    itemsize = jnp.dtype(logits_dtype).itemsize
    cap = _vmem_capacity_bytes()
    tile_budget = int(0.40 * cap)
    limit_cap = int(0.80 * cap)
    if tm is None:
        tm = _pick_tm_logits(B, D, itemsize, tile_budget)
    if tm_stats is None:
        tm_stats = _pick_tm_stats(B, itemsize, tile_budget)

    logits, partials, pos_diag = _pairwise_logits_call(
        context_embedding, target_embedding, kernel_scale, tm, log_group,
        logits_dtype, bf16_products, limit_cap)

    n_pos = float(B)
    n_neg = float(B * (B - 1))

    # ----- baseline / loss path: f32-exact, from the tiny partials (plain JAX) -----
    p = partials[::_PARTIAL_ROWS]                # (n_tiles, 128), one row per tile
    maxs, sumexps, sums, dsums = p[:, 0], p[:, 1], p[:, 2], p[:, 3]
    gmax = jnp.max(maxs)
    S = jnp.sum(sumexps * jnp.exp(maxs - gmax))          # sum exp(off-diag - gmax)
    lb = gmax + jnp.log(S) - jnp.log(n_neg)              # logmeanexp(neg)  ('batch')
    sum_all = jnp.sum(sums)
    sum_diag = jnp.sum(dsums)
    pos_mean = sum_diag / n_pos - lb
    neg_mean = (sum_all - sum_diag) / n_neg - lb
    attraction = -pos_mean                                # 'kld' divergence
    # repulsion from the same partials (with baseline='batch' it is algebraically ~0);
    # this replaces the previous B^2 exp pass in the stats kernel.
    repulsion = S * jnp.exp(gmax - lb) / n_neg - 1.0
    loss = attraction + repulsion

    out = {"loss": loss, "pos_logits": pos_mean, "neg_logits": neg_mean,
           "attraction": attraction, "repulsion": repulsion, "log_baseline": lb}

    # ----- sigmoid / threshold statistics: one streamed, parallel pass over logits -----
    sp = _stats_partials_call(logits, lb, tm_stats, limit_cap)[::_PARTIAL_ROWS]
    sum_sig_all = jnp.sum(sp[:, 0])
    cnt_gt_all = jnp.sum(sp[:, 1])
    diag_shift = pos_diag[:, 0] - lb                      # (B,) consistent with storage dtype
    sig_diag = jax.nn.sigmoid(diag_shift)
    gt_diag = (diag_shift > 0.0).astype(jnp.float32)
    out["pos_prob"] = jnp.mean(sig_diag)
    out["neg_prob"] = (sum_sig_all - jnp.sum(sig_diag)) / n_neg
    if with_classifier_metrics:
        TP = jnp.mean(gt_diag)
        FP = (cnt_gt_all - jnp.sum(gt_diag)) / n_neg
        FN = 1.0 - TP
        TN = 1.0 - FP
        precision = TP / (TP + FP)
        npv = TN / (TN + FN)
        out["accuracy"] = (TP + TN) / 2.0
        out["recall"] = TP
        out["precision"] = precision
        out["specificity"] = TN
        out["npv"] = npv
        out["apv"] = (precision + npv) / 2.0
    return out


# ---------------------------------------------------------------------------
# Pure-JAX reference for correctness checking.
# ---------------------------------------------------------------------------
def _reference_forward(context, target, scale=1.0):
    diff = context[:, None, :] - target[None, :, :]
    z = diff / scale
    logits = jnp.sum(-(jnp.log(jnp.pi) + jnp.log(scale)) - jnp.log(1.0 + z * z), axis=-1)
    B = logits.shape[0]
    pos = jnp.diagonal(logits)[:, None]
    neg = logits.reshape(-1)[:-1].reshape(B - 1, B + 1)[:, 1:].reshape(B, B - 1)
    log_baseline = jax.nn.logsumexp(neg) - jnp.log(float(neg.size))
    pos = pos - log_baseline
    neg = neg - log_baseline
    attraction = -pos.mean()
    repulsion = jnp.exp(neg).mean() - 1.0
    TP = (pos > 0).astype(jnp.float32).mean()
    FP = (neg > 0).astype(jnp.float32).mean()
    TN = (neg <= 0).astype(jnp.float32).mean()
    FN = (pos <= 0).astype(jnp.float32).mean()
    precision = TP / (TP + FP)
    npv = TN / (TN + FN)
    return {
        "loss": attraction + repulsion,
        "pos_logits": pos.mean(), "neg_logits": neg.mean(),
        "pos_prob": jax.nn.sigmoid(pos).mean(), "neg_prob": jax.nn.sigmoid(neg).mean(),
        "attraction": attraction, "repulsion": repulsion, "log_baseline": log_baseline,
        "accuracy": (TP + TN) / 2.0, "recall": TP, "precision": precision,
        "specificity": TN, "npv": npv, "apv": (precision + npv) / 2.0,
    }


if __name__ == "__main__":
    key = jax.random.PRNGKey(0)
    k1, k2 = jax.random.split(key)
    B, D = 8, 32
    context = jax.random.normal(k1, (B, D), dtype=jnp.float32)
    target = jax.random.normal(k2, (B, D), dtype=jnp.float32)

    ref = _reference_forward(context, target, 1.0)
    all_names = ("loss", "pos_logits", "neg_logits", "pos_prob", "neg_prob",
                 "attraction", "repulsion", "log_baseline", "accuracy", "recall",
                 "precision", "specificity", "npv", "apv")

    # 1) Exact-precision path (f32 logits intermediate): every metric vs reference.
    fwd_f32 = jax.jit(functools.partial(likelihood_ratio_estimator,
                                        kernel_scale=1.0, logits_dtype=jnp.float32))
    out_f32 = jax.tree_util.tree_map(jax.block_until_ready, fwd_f32(context, target))
    for name in all_names:
        np.testing.assert_allclose(np.asarray(out_f32[name]), np.asarray(ref[name]),
                                   rtol=1e-4, atol=1e-4, err_msg=name)

    # 2) Default path (bf16 logits intermediate): the loss path is f32-exact via the
    #    partials; sigmoid/threshold metrics see bf16 rounding, so only check the
    #    f32-exact metrics against the reference plus finiteness of the rest.
    fwd = jax.jit(functools.partial(likelihood_ratio_estimator, kernel_scale=1.0))
    out_bf16 = jax.tree_util.tree_map(jax.block_until_ready, fwd(context, target))
    for name in ("loss", "pos_logits", "neg_logits", "attraction", "repulsion",
                 "log_baseline"):
        np.testing.assert_allclose(np.asarray(out_bf16[name]), np.asarray(ref[name]),
                                   rtol=1e-4, atol=1e-4, err_msg=name)
    for name in all_names:
        assert np.isfinite(np.asarray(out_bf16[name])).all(), name

    print("KERNEL_OK")
</pallas_src>

<mosaic_0001>
module attributes {stable_mosaic.version = 11 : i64} {
  func.func @_pairwise_cauchy_kernel(%arg0: i32, %arg1: memref<8x32xf32, #tpu.memory_space<vmem>>, %arg2: memref<32x8xf32, #tpu.memory_space<vmem>>, %arg3: memref<8x8xf32, #tpu.memory_space<vmem>>, %arg4: memref<8x128xf32, #tpu.memory_space<vmem>>, %arg5: memref<8x1xf32, #tpu.memory_space<vmem>>) attributes {dimension_semantics = [#tpu.dimension_semantics<parallel>], iteration_bounds = array<i64: 1>, scalar_prefetch = 0 : i64, scratch_operands = 0 : i64, tpu.core_type = #tpu.core_type<tc>, window_params = [{transform_indices = @transform_0, window_bounds = array<i64: 8, 32>}, {pipeline_mode = #tpu.pipeline_mode<synchronous>, transform_indices = @transform_1, window_bounds = array<i64: 32, 8>}, {transform_indices = @transform_2, window_bounds = array<i64: 8, 8>}, {transform_indices = @transform_3, window_bounds = array<i64: 8, 128>}, {transform_indices = @transform_4, window_bounds = array<i64: 8, 1>}]} {
    %c0 = arith.constant 0 : index
    %c0_0 = arith.constant 0 : index
    %0 = vector.load %arg1[%c0, %c0_0] : memref<8x32xf32, #tpu.memory_space<vmem>>, vector<8x32xf32>
    %c0_1 = arith.constant 0 : index
    %c0_2 = arith.constant 0 : index
    %1 = vector.load %arg2[%c0_1, %c0_2] : memref<32x8xf32, #tpu.memory_space<vmem>>, vector<32x8xf32>
    %cst = arith.constant -36.6313553 : f32
    %2 = vector.broadcast %cst : f32 to vector<8x8xf32>
    %3 = vector.extract_strided_slice %1 {offsets = [0, 0], sizes = [1, 8], strides = [1, 1]} : vector<32x8xf32> to vector<1x8xf32>
    %4 = vector.extract_strided_slice %0 {offsets = [0, 0], sizes = [8, 1], strides = [1, 1]} : vector<8x32xf32> to vector<8x1xf32>
    %5 = vector.broadcast %3 : vector<1x8xf32> to vector<8x8xf32>
    %6 = vector.broadcast %4 : vector<8x1xf32> to vector<8x8xf32>
    %7 = arith.subf %5, %6 : vector<8x8xf32>
    %8 = arith.mulf %7, %7 : vector<8x8xf32>
    %cst_3 = arith.constant 1.000000e+00 : f32
    %9 = vector.broadcast %cst_3 : f32 to vector<8x8xf32>
    %10 = arith.addf %9, %8 : vector<8x8xf32>
    %11 = vector.extract_strided_slice %1 {offsets = [1, 0], sizes = [1, 8], strides = [1, 1]} : vector<32x8xf32> to vector<1x8xf32>
    %12 = vector.extract_strided_slice %0 {offsets = [0, 1], sizes = [8, 1], strides = [1, 1]} : vector<8x32xf32> to vector<8x1xf32>
    %13 = vector.broadcast %11 : vector<1x8xf32> to vector<8x8xf32>
    %14 = vector.broadcast %12 : vector<8x1xf32> to vector<8x8xf32>
    %15 = arith.subf %13, %14 : vector<8x8xf32>
    %16 = arith.mulf %15, %15 : vector<8x8xf32>
    %cst_4 = arith.constant 1.000000e+00 : f32
    %17 = vector.broadcast %cst_4 : f32 to vector<8x8xf32>
    %18 = arith.addf %17, %16 : vector<8x8xf32>
    %19 = arith.mulf %10, %18 : vector<8x8xf32>
    %20 = vector.extract_strided_slice %1 {offsets = [2, 0], sizes = [1, 8], strides = [1, 1]} : vector<32x8xf32> to vector<1x8xf32>
    %21 = vector.extract_strided_slice %0 {offsets = [0, 2], sizes = [8, 1], strides = [1, 1]} : vector<8x32xf32> to vector<8x1xf32>
    %22 = vector.broadcast %20 : vector<1x8xf32> to vector<8x8xf32>
    %23 = vector.broadcast %21 : vector<8x1xf32> to vector<8x8xf32>
    %24 = arith.subf %22, %23 : vector<8x8xf32>
    %25 = arith.mulf %24, %24 : vector<8x8xf32>
    %cst_5 = arith.constant 1.000000e+00 : f32
    %26 = vector.broadcast %cst_5 : f32 to vector<8x8xf32>
    %27 = arith.addf %26, %25 : vector<8x8xf32>
    %28 = arith.mulf %19, %27 : vector<8x8xf32>
    %29 = vector.extract_strided_slice %1 {offsets = [3, 0], sizes = [1, 8], strides = [1, 1]} : vector<32x8xf32> to vector<1x8xf32>
    %30 = vector.extract_strided_slice %0 {offsets = [0, 3], sizes = [8, 1], strides = [1, 1]} : vector<8x32xf32> to vector<8x1xf32>
    %31 = vector.broadcast %29 : vector<1x8xf32> to vector<8x8xf32>
    %32 = vector.broadcast %30 : vector<8x1xf32> to vector<8x8xf32>
    %33 = arith.subf %31, %32 : vector<8x8xf32>
    %34 = arith.mulf %33, %33 : vector<8x8xf32>
    %cst_6 = arith.constant 1.000000e+00 : f32
    %35 = vector.broadcast %cst_6 : f32 to vector<8x8xf32>
    %36 = arith.addf %35, %34 : vector<8x8xf32>
    %37 = arith.mulf %28, %36 : vector<8x8xf32>
    %38 = math.log %37 : vector<8x8xf32>
    %39 = arith.subf %2, %38 : vector<8x8xf32>
    %40 = vector.extract_strided_slice %1 {offsets = [4, 0], sizes = [1, 8], strides = [1, 1]} : vector<32x8xf32> to vector<1x8xf32>
    %41 = vector.extract_strided_slice %0 {offsets = [0, 4], sizes = [8, 1], strides = [1, 1]} : vector<8x32xf32> to vector<8x1xf32>
    %42 = vector.broadcast %40 : vector<1x8xf32> to vector<8x8xf32>
    %43 = vector.broadcast %41 : vector<8x1xf32> to vector<8x8xf32>
    %44 = arith.subf %42, %43 : vector<8x8xf32>
    %45 = arith.mulf %44, %44 : vector<8x8xf32>
    %cst_7 = arith.constant 1.000000e+00 : f32
    %46 = vector.broadcast %cst_7 : f32 to vector<8x8xf32>
    %47 = arith.addf %46, %45 : vector<8x8xf32>
    %48 = vector.extract_strided_slice %1 {offsets = [5, 0], sizes = [1, 8], strides = [1, 1]} : vector<32x8xf32> to vector<1x8xf32>
    %49 = vector.extract_strided_slice %0 {offsets = [0, 5], sizes = [8, 1], strides = [1, 1]} : vector<8x32xf32> to vector<8x1xf32>
    %50 = vector.broadcast %48 : vector<1x8xf32> to vector<8x8xf32>
    %51 = vector.broadcast %49 : vector<8x1xf32> to vector<8x8xf32>
    %52 = arith.subf %50, %51 : vector<8x8xf32>
    %53 = arith.mulf %52, %52 : vector<8x8xf32>
    %cst_8 = arith.constant 1.000000e+00 : f32
    %54 = vector.broadcast %cst_8 : f32 to vector<8x8xf32>
    %55 = arith.addf %54, %53 : vector<8x8xf32>
    %56 = arith.mulf %47, %55 : vector<8x8xf32>
    %57 = vector.extract_strided_slice %1 {offsets = [6, 0], sizes = [1, 8], strides = [1, 1]} : vector<32x8xf32> to vector<1x8xf32>
    %58 = vector.extract_strided_slice %0 {offsets = [0, 6], sizes = [8, 1], strides = [1, 1]} : vector<8x32xf32> to vector<8x1xf32>
    %59 = vector.broadcast %57 : vector<1x8xf32> to vector<8x8xf32>
    %60 = vector.broadcast %58 : vector<8x1xf32> to vector<8x8xf32>
    %61 = arith.subf %59, %60 : vector<8x8xf32>
    %62 = arith.mulf %61, %61 : vector<8x8xf32>
    %cst_9 = arith.constant 1.000000e+00 : f32
    %63 = vector.broadcast %cst_9 : f32 to vector<8x8xf32>
    %64 = arith.addf %63, %62 : vector<8x8xf32>
    %65 = arith.mulf %56, %64 : vector<8x8xf32>
    %66 = vector.extract_strided_slice %1 {offsets = [7, 0], sizes = [1, 8], strides = [1, 1]} : vector<32x8xf32> to vector<1x8xf32>
    %67 = vector.extract_strided_slice %0 {offsets = [0, 7], sizes = [8, 1], strides = [1, 1]} : vector<8x32xf32> to vector<8x1xf32>
    %68 = vector.broadcast %66 : vector<1x8xf32> to vector<8x8xf32>
    %69 = vector.broadcast %67 : vector<8x1xf32> to vector<8x8xf32>
    %70 = arith.subf %68, %69 : vector<8x8xf32>
    %71 = arith.mulf %70, %70 : vector<8x8xf32>
    %cst_10 = arith.constant 1.000000e+00 : f32
    %72 = vector.broadcast %cst_10 : f32 to vector<8x8xf32>
    %73 = arith.addf %72, %71 : vector<8x8xf32>
    %74 = arith.mulf %65, %73 : vector<8x8xf32>
    %75 = math.log %74 : vector<8x8xf32>
    %76 = arith.subf %39, %75 : vector<8x8xf32>
    %77 = vector.extract_strided_slice %1 {offsets = [8, 0], sizes = [1, 8], strides = [1, 1]} : vector<32x8xf32> to vector<1x8xf32>
    %78 = vector.extract_strided_slice %0 {offsets = [0, 8], sizes = [8, 1], strides = [1, 1]} : vector<8x32xf32> to vector<8x1xf32>
    %79 = vector.broadcast %77 : vector<1x8xf32> to vector<8x8xf32>
    %80 = vector.broadcast %78 : vector<8x1xf32> to vector<8x8xf32>
    %81 = arith.subf %79, %80 : vector<8x8xf32>
    %82 = arith.mulf %81, %81 : vector<8x8xf32>
    %cst_11 = arith.constant 1.000000e+00 : f32
    %83 = vector.broadcast %cst_11 : f32 to vector<8x8xf32>
    %84 = arith.addf %83, %82 : vector<8x8xf32>
    %85 = vector.extract_strided_slice %1 {offsets = [9, 0], sizes = [1, 8], strides = [1, 1]} : vector<32x8xf32> to vector<1x8xf32>
    %86 = vector.extract_strided_slice %0 {offsets = [0, 9], sizes = [8, 1], strides = [1, 1]} : vector<8x32xf32> to vector<8x1xf32>
    %87 = vector.broadcast %85 : vector<1x8xf32> to vector<8x8xf32>
    %88 = vector.broadcast %86 : vector<8x1xf32> to vector<8x8xf32>
    %89 = arith.subf %87, %88 : vector<8x8xf32>
    %90 = arith.mulf %89, %89 : vector<8x8xf32>
    %cst_12 = arith.constant 1.000000e+00 : f32
    %91 = vector.broadcast %cst_12 : f32 to vector<8x8xf32>
    %92 = arith.addf %91, %90 : vector<8x8xf32>
    %93 = arith.mulf %84, %92 : vector<8x8xf32>
    %94 = vector.extract_strided_slice %1 {offsets = [10, 0], sizes = [1, 8], strides = [1, 1]} : vector<32x8xf32> to vector<1x8xf32>
    %95 = vector.extract_strided_slice %0 {offsets = [0, 10], sizes = [8, 1], strides = [1, 1]} : vector<8x32xf32> to vector<8x1xf32>
    %96 = vector.broadcast %94 : vector<1x8xf32> to vector<8x8xf32>
    %97 = vector.broadcast %95 : vector<8x1xf32> to vector<8x8xf32>
    %98 = arith.subf %96, %97 : vector<8x8xf32>
    %99 = arith.mulf %98, %98 : vector<8x8xf32>
    %cst_13 = arith.constant 1.000000e+00 : f32
    %100 = vector.broadcast %cst_13 : f32 to vector<8x8xf32>
    %101 = arith.addf %100, %99 : vector<8x8xf32>
    %102 = arith.mulf %93, %101 : vector<8x8xf32>
    %103 = vector.extract_strided_slice %1 {offsets = [11, 0], sizes = [1, 8], strides = [1, 1]} : vector<32x8xf32> to vector<1x8xf32>
    %104 = vector.extract_strided_slice %0 {offsets = [0, 11], sizes = [8, 1], strides = [1, 1]} : vector<8x32xf32> to vector<8x1xf32>
    %105 = vector.broadcast %103 : vector<1x8xf32> to vector<8x8xf32>
    %106 = vector.broadcast %104 : vector<8x1xf32> to vector<8x8xf32>
    %107 = arith.subf %105, %106 : vector<8x8xf32>
    %108 = arith.mulf %107, %107 : vector<8x8xf32>
    %cst_14 = arith.constant 1.000000e+00 : f32
    %109 = vector.broadcast %cst_14 : f32 to vector<8x8xf32>
    %110 = arith.addf %109, %108 : vector<8x8xf32>
    %111 = arith.mulf %102, %110 : vector<8x8xf32>
    %112 = math.log %111 : vector<8x8xf32>
    %113 = arith.subf %76, %112 : vector<8x8xf32>
    %114 = vector.extract_strided_slice %1 {offsets = [12, 0], sizes = [1, 8], strides = [1, 1]} : vector<32x8xf32> to vector<1x8xf32>
    %115 = vector.extract_strided_slice %0 {offsets = [0, 12], sizes = [8, 1], strides = [1, 1]} : vector<8x32xf32> to vector<8x1xf32>
    %116 = vector.broadcast %114 : vector<1x8xf32> to vector<8x8xf32>
    %117 = vector.broadcast %115 : vector<8x1xf32> to vector<8x8xf32>
    %118 = arith.subf %116, %117 : vector<8x8xf32>
    %119 = arith.mulf %118, %118 : vector<8x8xf32>
    %cst_15 = arith.constant 1.000000e+00 : f32
    %120 = vector.broadcast %cst_15 : f32 to vector<8x8xf32>
    %121 = arith.addf %120, %119 : vector<8x8xf32>
    %122 = vector.extract_strided_slice %1 {offsets = [13, 0], sizes = [1, 8], strides = [1, 1]} : vector<32x8xf32> to vector<1x8xf32>
    %123 = vector.extract_strided_slice %0 {offsets = [0, 13], sizes = [8, 1], strides = [1, 1]} : vector<8x32xf32> to vector<8x1xf32>
    %124 = vector.broadcast %122 : vector<1x8xf32> to vector<8x8xf32>
    %125 = vector.broadcast %123 : vector<8x1xf32> to vector<8x8xf32>
    %126 = arith.subf %124, %125 : vector<8x8xf32>
    %127 = arith.mulf %126, %126 : vector<8x8xf32>
    %cst_16 = arith.constant 1.000000e+00 : f32
    %128 = vector.broadcast %cst_16 : f32 to vector<8x8xf32>
    %129 = arith.addf %128, %127 : vector<8x8xf32>
    %130 = arith.mulf %121, %129 : vector<8x8xf32>
    %131 = vector.extract_strided_slice %1 {offsets = [14, 0], sizes = [1, 8], strides = [1, 1]} : vector<32x8xf32> to vector<1x8xf32>
    %132 = vector.extract_strided_slice %0 {offsets = [0, 14], sizes = [8, 1], strides = [1, 1]} : vector<8x32xf32> to vector<8x1xf32>
    %133 = vector.broadcast %131 : vector<1x8xf32> to vector<8x8xf32>
    %134 = vector.broadcast %132 : vector<8x1xf32> to vector<8x8xf32>
    %135 = arith.subf %133, %134 : vector<8x8xf32>
    %136 = arith.mulf %135, %135 : vector<8x8xf32>
    %cst_17 = arith.constant 1.000000e+00 : f32
    %137 = vector.broadcast %cst_17 : f32 to vector<8x8xf32>
    %138 = arith.addf %137, %136 : vector<8x8xf32>
    %139 = arith.mulf %130, %138 : vector<8x8xf32>
    %140 = vector.extract_strided_slice %1 {offsets = [15, 0], sizes = [1, 8], strides = [1, 1]} : vector<32x8xf32> to vector<1x8xf32>
    %141 = vector.extract_strided_slice %0 {offsets = [0, 15], sizes = [8, 1], strides = [1, 1]} : vector<8x32xf32> to vector<8x1xf32>
    %142 = vector.broadcast %140 : vector<1x8xf32> to vector<8x8xf32>
    %143 = vector.broadcast %141 : vector<8x1xf32> to vector<8x8xf32>
    %144 = arith.subf %142, %143 : vector<8x8xf32>
    %145 = arith.mulf %144, %144 : vector<8x8xf32>
    %cst_18 = arith.constant 1.000000e+00 : f32
    %146 = vector.broadcast %cst_18 : f32 to vector<8x8xf32>
    %147 = arith.addf %146, %145 : vector<8x8xf32>
    %148 = arith.mulf %139, %147 : vector<8x8xf32>
    %149 = math.log %148 : vector<8x8xf32>
    %150 = arith.subf %113, %149 : vector<8x8xf32>
    %151 = vector.extract_strided_slice %1 {offsets = [16, 0], sizes = [1, 8], strides = [1, 1]} : vector<32x8xf32> to vector<1x8xf32>
    %152 = vector.extract_strided_slice %0 {offsets = [0, 16], sizes = [8, 1], strides = [1, 1]} : vector<8x32xf32> to vector<8x1xf32>
    %153 = vector.broadcast %151 : vector<1x8xf32> to vector<8x8xf32>
    %154 = vector.broadcast %152 : vector<8x1xf32> to vector<8x8xf32>
    %155 = arith.subf %153, %154 : vector<8x8xf32>
    %156 = arith.mulf %155, %155 : vector<8x8xf32>
    %cst_19 = arith.constant 1.000000e+00 : f32
    %157 = vector.broadcast %cst_19 : f32 to vector<8x8xf32>
    %158 = arith.addf %157, %156 : vector<8x8xf32>
    %159 = vector.extract_strided_slice %1 {offsets = [17, 0], sizes = [1, 8], strides = [1, 1]} : vector<32x8xf32> to vector<1x8xf32>
    %160 = vector.extract_strided_slice %0 {offsets = [0, 17], sizes = [8, 1], strides = [1, 1]} : vector<8x32xf32> to vector<8x1xf32>
    %161 = vector.broadcast %159 : vector<1x8xf32> to vector<8x8xf32>
    %162 = vector.broadcast %160 : vector<8x1xf32> to vector<8x8xf32>
    %163 = arith.subf %161, %162 : vector<8x8xf32>
    %164 = arith.mulf %163, %163 : vector<8x8xf32>
    %cst_20 = arith.constant 1.000000e+00 : f32
    %165 = vector.broadcast %cst_20 : f32 to vector<8x8xf32>
    %166 = arith.addf %165, %164 : vector<8x8xf32>
    %167 = arith.mulf %158, %166 : vector<8x8xf32>
    %168 = vector.extract_strided_slice %1 {offsets = [18, 0], sizes = [1, 8], strides = [1, 1]} : vector<32x8xf32> to vector<1x8xf32>
    %169 = vector.extract_strided_slice %0 {offsets = [0, 18], sizes = [8, 1], strides = [1, 1]} : vector<8x32xf32> to vector<8x1xf32>
    %170 = vector.broadcast %168 : vector<1x8xf32> to vector<8x8xf32>
    %171 = vector.broadcast %169 : vector<8x1xf32> to vector<8x8xf32>
    %172 = arith.subf %170, %171 : vector<8x8xf32>
    %173 = arith.mulf %172, %172 : vector<8x8xf32>
    %cst_21 = arith.constant 1.000000e+00 : f32
    %174 = vector.broadcast %cst_21 : f32 to vector<8x8xf32>
    %175 = arith.addf %174, %173 : vector<8x8xf32>
    %176 = arith.mulf %167, %175 : vector<8x8xf32>
    %177 = vector.extract_strided_slice %1 {offsets = [19, 0], sizes = [1, 8], strides = [1, 1]} : vector<32x8xf32> to vector<1x8xf32>
    %178 = vector.extract_strided_slice %0 {offsets = [0, 19], sizes = [8, 1], strides = [1, 1]} : vector<8x32xf32> to vector<8x1xf32>
    %179 = vector.broadcast %177 : vector<1x8xf32> to vector<8x8xf32>
    %180 = vector.broadcast %178 : vector<8x1xf32> to vector<8x8xf32>
    %181 = arith.subf %179, %180 : vector<8x8xf32>
    %182 = arith.mulf %181, %181 : vector<8x8xf32>
    %cst_22 = arith.constant 1.000000e+00 : f32
    %183 = vector.broadcast %cst_22 : f32 to vector<8x8xf32>
    %184 = arith.addf %183, %182 : vector<8x8xf32>
    %185 = arith.mulf %176, %184 : vector<8x8xf32>
    %186 = math.log %185 : vector<8x8xf32>
    %187 = arith.subf %150, %186 : vector<8x8xf32>
    %188 = vector.extract_strided_slice %1 {offsets = [20, 0], sizes = [1, 8], strides = [1, 1]} : vector<32x8xf32> to vector<1x8xf32>
    %189 = vector.extract_strided_slice %0 {offsets = [0, 20], sizes = [8, 1], strides = [1, 1]} : vector<8x32xf32> to vector<8x1xf32>
    %190 = vector.broadcast %188 : vector<1x8xf32> to vector<8x8xf32>
    %191 = vector.broadcast %189 : vector<8x1xf32> to vector<8x8xf32>
    %192 = arith.subf %190, %191 : vector<8x8xf32>
    %193 = arith.mulf %192, %192 : vector<8x8xf32>
    %cst_23 = arith.constant 1.000000e+00 : f32
    %194 = vector.broadcast %cst_23 : f32 to vector<8x8xf32>
    %195 = arith.addf %194, %193 : vector<8x8xf32>
    %196 = vector.extract_strided_slice %1 {offsets = [21, 0], sizes = [1, 8], strides = [1, 1]} : vector<32x8xf32> to vector<1x8xf32>
    %197 = vector.extract_strided_slice %0 {offsets = [0, 21], sizes = [8, 1], strides = [1, 1]} : vector<8x32xf32> to vector<8x1xf32>
    %198 = vector.broadcast %196 : vector<1x8xf32> to vector<8x8xf32>
    %199 = vector.broadcast %197 : vector<8x1xf32> to vector<8x8xf32>
    %200 = arith.subf %198, %199 : vector<8x8xf32>
    %201 = arith.mulf %200, %200 : vector<8x8xf32>
    %cst_24 = arith.constant 1.000000e+00 : f32
    %202 = vector.broadcast %cst_24 : f32 to vector<8x8xf32>
    %203 = arith.addf %202, %201 : vector<8x8xf32>
    %204 = arith.mulf %195, %203 : vector<8x8xf32>
    %205 = vector.extract_strided_slice %1 {offsets = [22, 0], sizes = [1, 8], strides = [1, 1]} : vector<32x8xf32> to vector<1x8xf32>
    %206 = vector.extract_strided_slice %0 {offsets = [0, 22], sizes = [8, 1], strides = [1, 1]} : vector<8x32xf32> to vector<8x1xf32>
    %207 = vector.broadcast %205 : vector<1x8xf32> to vector<8x8xf32>
    %208 = vector.broadcast %206 : vector<8x1xf32> to vector<8x8xf32>
    %209 = arith.subf %207, %208 : vector<8x8xf32>
    %210 = arith.mulf %209, %209 : vector<8x8xf32>
    %cst_25 = arith.constant 1.000000e+00 : f32
    %211 = vector.broadcast %cst_25 : f32 to vector<8x8xf32>
    %212 = arith.addf %211, %210 : vector<8x8xf32>
    %213 = arith.mulf %204, %212 : vector<8x8xf32>
    %214 = vector.extract_strided_slice %1 {offsets = [23, 0], sizes = [1, 8], strides = [1, 1]} : vector<32x8xf32> to vector<1x8xf32>
    %215 = vector.extract_strided_slice %0 {offsets = [0, 23], sizes = [8, 1], strides = [1, 1]} : vector<8x32xf32> to vector<8x1xf32>
    %216 = vector.broadcast %214 : vector<1x8xf32> to vector<8x8xf32>
    %217 = vector.broadcast %215 : vector<8x1xf32> to vector<8x8xf32>
    %218 = arith.subf %216, %217 : vector<8x8xf32>
    %219 = arith.mulf %218, %218 : vector<8x8xf32>
    %cst_26 = arith.constant 1.000000e+00 : f32
    %220 = vector.broadcast %cst_26 : f32 to vector<8x8xf32>
    %221 = arith.addf %220, %219 : vector<8x8xf32>
    %222 = arith.mulf %213, %221 : vector<8x8xf32>
    %223 = math.log %222 : vector<8x8xf32>
    %224 = arith.subf %187, %223 : vector<8x8xf32>
    %225 = vector.extract_strided_slice %1 {offsets = [24, 0], sizes = [1, 8], strides = [1, 1]} : vector<32x8xf32> to vector<1x8xf32>
    %226 = vector.extract_strided_slice %0 {offsets = [0, 24], sizes = [8, 1], strides = [1, 1]} : vector<8x32xf32> to vector<8x1xf32>
    %227 = vector.broadcast %225 : vector<1x8xf32> to vector<8x8xf32>
    %228 = vector.broadcast %226 : vector<8x1xf32> to vector<8x8xf32>
    %229 = arith.subf %227, %228 : vector<8x8xf32>
    %230 = arith.mulf %229, %229 : vector<8x8xf32>
    %cst_27 = arith.constant 1.000000e+00 : f32
    %231 = vector.broadcast %cst_27 : f32 to vector<8x8xf32>
    %232 = arith.addf %231, %230 : vector<8x8xf32>
    %233 = vector.extract_strided_slice %1 {offsets = [25, 0], sizes = [1, 8], strides = [1, 1]} : vector<32x8xf32> to vector<1x8xf32>
    %234 = vector.extract_strided_slice %0 {offsets = [0, 25], sizes = [8, 1], strides = [1, 1]} : vector<8x32xf32> to vector<8x1xf32>
    %235 = vector.broadcast %233 : vector<1x8xf32> to vector<8x8xf32>
    %236 = vector.broadcast %234 : vector<8x1xf32> to vector<8x8xf32>
    %237 = arith.subf %235, %236 : vector<8x8xf32>
    %238 = arith.mulf %237, %237 : vector<8x8xf32>
    %cst_28 = arith.constant 1.000000e+00 : f32
    %239 = vector.broadcast %cst_28 : f32 to vector<8x8xf32>
    %240 = arith.addf %239, %238 : vector<8x8xf32>
    %241 = arith.mulf %232, %240 : vector<8x8xf32>
    %242 = vector.extract_strided_slice %1 {offsets = [26, 0], sizes = [1, 8], strides = [1, 1]} : vector<32x8xf32> to vector<1x8xf32>
    %243 = vector.extract_strided_slice %0 {offsets = [0, 26], sizes = [8, 1], strides = [1, 1]} : vector<8x32xf32> to vector<8x1xf32>
    %244 = vector.broadcast %242 : vector<1x8xf32> to vector<8x8xf32>
    %245 = vector.broadcast %243 : vector<8x1xf32> to vector<8x8xf32>
    %246 = arith.subf %244, %245 : vector<8x8xf32>
    %247 = arith.mulf %246, %246 : vector<8x8xf32>
    %cst_29 = arith.constant 1.000000e+00 : f32
    %248 = vector.broadcast %cst_29 : f32 to vector<8x8xf32>
    %249 = arith.addf %248, %247 : vector<8x8xf32>
    %250 = arith.mulf %241, %249 : vector<8x8xf32>
    %251 = vector.extract_strided_slice %1 {offsets = [27, 0], sizes = [1, 8], strides = [1, 1]} : vector<32x8xf32> to vector<1x8xf32>
    %252 = vector.extract_strided_slice %0 {offsets = [0, 27], sizes = [8, 1], strides = [1, 1]} : vector<8x32xf32> to vector<8x1xf32>
    %253 = vector.broadcast %251 : vector<1x8xf32> to vector<8x8xf32>
    %254 = vector.broadcast %252 : vector<8x1xf32> to vector<8x8xf32>
    %255 = arith.subf %253, %254 : vector<8x8xf32>
    %256 = arith.mulf %255, %255 : vector<8x8xf32>
    %cst_30 = arith.constant 1.000000e+00 : f32
    %257 = vector.broadcast %cst_30 : f32 to vector<8x8xf32>
    %258 = arith.addf %257, %256 : vector<8x8xf32>
    %259 = arith.mulf %250, %258 : vector<8x8xf32>
    %260 = math.log %259 : vector<8x8xf32>
    %261 = arith.subf %224, %260 : vector<8x8xf32>
    %262 = vector.extract_strided_slice %1 {offsets = [28, 0], sizes = [1, 8], strides = [1, 1]} : vector<32x8xf32> to vector<1x8xf32>
    %263 = vector.extract_strided_slice %0 {offsets = [0, 28], sizes = [8, 1], strides = [1, 1]} : vector<8x32xf32> to vector<8x1xf32>
    %264 = vector.broadcast %262 : vector<1x8xf32> to vector<8x8xf32>
    %265 = vector.broadcast %263 : vector<8x1xf32> to vector<8x8xf32>
    %266 = arith.subf %264, %265 : vector<8x8xf32>
    %267 = arith.mulf %266, %266 : vector<8x8xf32>
    %cst_31 = arith.constant 1.000000e+00 : f32
    %268 = vector.broadcast %cst_31 : f32 to vector<8x8xf32>
    %269 = arith.addf %268, %267 : vector<8x8xf32>
    %270 = vector.extract_strided_slice %1 {offsets = [29, 0], sizes = [1, 8], strides = [1, 1]} : vector<32x8xf32> to vector<1x8xf32>
    %271 = vector.extract_strided_slice %0 {offsets = [0, 29], sizes = [8, 1], strides = [1, 1]} : vector<8x32xf32> to vector<8x1xf32>
    %272 = vector.broadcast %270 : vector<1x8xf32> to vector<8x8xf32>
    %273 = vector.broadcast %271 : vector<8x1xf32> to vector<8x8xf32>
    %274 = arith.subf %272, %273 : vector<8x8xf32>
    %275 = arith.mulf %274, %274 : vector<8x8xf32>
    %cst_32 = arith.constant 1.000000e+00 : f32
    %276 = vector.broadcast %cst_32 : f32 to vector<8x8xf32>
    %277 = arith.addf %276, %275 : vector<8x8xf32>
    %278 = arith.mulf %269, %277 : vector<8x8xf32>
    %279 = vector.extract_strided_slice %1 {offsets = [30, 0], sizes = [1, 8], strides = [1, 1]} : vector<32x8xf32> to vector<1x8xf32>
    %280 = vector.extract_strided_slice %0 {offsets = [0, 30], sizes = [8, 1], strides = [1, 1]} : vector<8x32xf32> to vector<8x1xf32>
    %281 = vector.broadcast %279 : vector<1x8xf32> to vector<8x8xf32>
    %282 = vector.broadcast %280 : vector<8x1xf32> to vector<8x8xf32>
    %283 = arith.subf %281, %282 : vector<8x8xf32>
    %284 = arith.mulf %283, %283 : vector<8x8xf32>
    %cst_33 = arith.constant 1.000000e+00 : f32
    %285 = vector.broadcast %cst_33 : f32 to vector<8x8xf32>
    %286 = arith.addf %285, %284 : vector<8x8xf32>
    %287 = arith.mulf %278, %286 : vector<8x8xf32>
    %288 = vector.extract_strided_slice %1 {offsets = [31, 0], sizes = [1, 8], strides = [1, 1]} : vector<32x8xf32> to vector<1x8xf32>
    %289 = vector.extract_strided_slice %0 {offsets = [0, 31], sizes = [8, 1], strides = [1, 1]} : vector<8x32xf32> to vector<8x1xf32>
    %290 = vector.broadcast %288 : vector<1x8xf32> to vector<8x8xf32>
    %291 = vector.broadcast %289 : vector<8x1xf32> to vector<8x8xf32>
    %292 = arith.subf %290, %291 : vector<8x8xf32>
    %293 = arith.mulf %292, %292 : vector<8x8xf32>
    %cst_34 = arith.constant 1.000000e+00 : f32
    %294 = vector.broadcast %cst_34 : f32 to vector<8x8xf32>
    %295 = arith.addf %294, %293 : vector<8x8xf32>
    %296 = arith.mulf %287, %295 : vector<8x8xf32>
    %297 = math.log %296 : vector<8x8xf32>
    %298 = arith.subf %261, %297 : vector<8x8xf32>
    %c0_35 = arith.constant 0 : index
    %c0_36 = arith.constant 0 : index
    %299 = vector.load %arg3[%c0_35, %c0_36] : memref<8x8xf32, #tpu.memory_space<vmem>>, vector<8x8xf32>
    tpu.vector_store %arg3[%c0_35, %c0_36], %298 {strides = array<i32>} : memref<8x8xf32, #tpu.memory_space<vmem>>, vector<8x8xf32>,
    %c8_i32 = arith.constant 8 : i32
    %300 = arith.muli %arg0, %c8_i32 : i32
    %301 = tpu.iota {dimensions = array<i32: 0>} : vector<8x8xi32>
    %302 = tpu.iota {dimensions = array<i32: 1>} : vector<8x8xi32>
    %303 = vector.broadcast %300 : i32 to vector<8x8xi32>
    %304 = arith.addi %301, %303 : vector<8x8xi32>
    %305 = arith.cmpi eq, %302, %304 : vector<8x8xi32>
    %cst_37 = arith.constant 0xFF800000 : f32
    %306 = vector.broadcast %cst_37 : f32 to vector<8x8xf32>
    %307 = arith.select %305, %306, %298 : vector<8x8xi1>, vector<8x8xf32>
    %308 = vector.shape_cast %307 : vector<8x8xf32> to vector<1x8x8xf32>
    %cst_38 = arith.constant dense<0xFF800000> : vector<1xf32>
    %309 = vector.multi_reduction <maximumf>, %308, %cst_38 [1, 2] : vector<1x8x8xf32> to vector<1xf32>
    %310 = vector.shape_cast %309 : vector<1xf32> to vector<1x1x1xf32>
    %311 = vector.extract %310[0, 0, 0] : f32 from vector<1x1x1xf32>
    %312 = vector.broadcast %311 : f32 to vector<8x8xf32>
    %313 = arith.subf %307, %312 : vector<8x8xf32>
    %314 = math.exp %313 : vector<8x8xf32>
    %315 = vector.shape_cast %314 : vector<8x8xf32> to vector<1x8x8xf32>
    %cst_39 = arith.constant dense<0.000000e+00> : vector<1xf32>
    %316 = vector.multi_reduction <add>, %315, %cst_39 [1, 2] : vector<1x8x8xf32> to vector<1xf32>
    %317 = vector.shape_cast %316 : vector<1xf32> to vector<1x1x1xf32>
    %318 = vector.extract %317[0, 0, 0] : f32 from vector<1x1x1xf32>
    %319 = vector.shape_cast %298 : vector<8x8xf32> to vector<1x8x8xf32>
    %cst_40 = arith.constant dense<0.000000e+00> : vector<1xf32>
    %320 = vector.multi_reduction <add>, %319, %cst_40 [1, 2] : vector<1x8x8xf32> to vector<1xf32>
    %321 = vector.shape_cast %320 : vector<1xf32> to vector<1x1x1xf32>
    %322 = vector.extract %321[0, 0, 0] : f32 from vector<1x1x1xf32>
    %cst_41 = arith.constant 0.000000e+00 : f32
    %323 = vector.broadcast %cst_41 : f32 to vector<8x8xf32>
    %324 = arith.select %305, %298, %323 : vector<8x8xi1>, vector<8x8xf32>
    %cst_42 = arith.constant dense<0.000000e+00> : vector<8xf32>
    %325 = vector.multi_reduction <add>, %324, %cst_42 [1] : vector<8x8xf32> to vector<8xf32>
    %326 = vector.shape_cast %325 : vector<8xf32> to vector<8x1xf32>
    %327 = vector.shape_cast %326 : vector<8x1xf32> to vector<1x8x1xf32>
    %cst_43 = arith.constant dense<0.000000e+00> : vector<1xf32>
    %328 = vector.multi_reduction <add>, %327, %cst_43 [1, 2] : vector<1x8x1xf32> to vector<1xf32>
    %329 = vector.shape_cast %328 : vector<1xf32> to vector<1x1x1xf32>
    %330 = vector.extract %329[0, 0, 0] : f32 from vector<1x1x1xf32>
    %c0_44 = arith.constant 0 : index
    %c0_45 = arith.constant 0 : index
    %331 = vector.load %arg5[%c0_44, %c0_45] : memref<8x1xf32, #tpu.memory_space<vmem>>, vector<8x1xf32>
    tpu.vector_store %arg5[%c0_44, %c0_45], %326 {strides = array<i32>} : memref<8x1xf32, #tpu.memory_space<vmem>>, vector<8x1xf32>,
    %332 = tpu.iota {dimensions = array<i32: 1>} : vector<8x128xi32>
    %c0_i32 = arith.constant 0 : i32
    %333 = vector.broadcast %c0_i32 : i32 to vector<8x128xi32>
    %334 = arith.cmpi eq, %332, %333 : vector<8x128xi32>
    %c1_i32 = arith.constant 1 : i32
    %335 = vector.broadcast %c1_i32 : i32 to vector<8x128xi32>
    %336 = arith.cmpi eq, %332, %335 : vector<8x128xi32>
    %c2_i32 = arith.constant 2 : i32
    %337 = vector.broadcast %c2_i32 : i32 to vector<8x128xi32>
    %338 = arith.cmpi eq, %332, %337 : vector<8x128xi32>
    %c3_i32 = arith.constant 3 : i32
    %339 = vector.broadcast %c3_i32 : i32 to vector<8x128xi32>
    %340 = arith.cmpi eq, %332, %339 : vector<8x128xi32>
    %cst_46 = arith.constant 0.000000e+00 : f32
    %341 = vector.broadcast %330 : f32 to vector<8x128xf32>
    %342 = vector.broadcast %cst_46 : f32 to vector<8x128xf32>
    %343 = arith.select %340, %341, %342 : vector<8x128xi1>, vector<8x128xf32>
    %344 = vector.broadcast %322 : f32 to vector<8x128xf32>
    %345 = arith.select %338, %344, %343 : vector<8x128xi1>, vector<8x128xf32>
    %346 = vector.broadcast %318 : f32 to vector<8x128xf32>
    %347 = arith.select %336, %346, %345 : vector<8x128xi1>, vector<8x128xf32>
    %348 = vector.broadcast %311 : f32 to vector<8x128xf32>
    %349 = arith.select %334, %348, %347 : vector<8x128xi1>, vector<8x128xf32>
    %c0_47 = arith.constant 0 : index
    %c0_48 = arith.constant 0 : index
    %350 = vector.load %arg4[%c0_47, %c0_48] : memref<8x128xf32, #tpu.memory_space<vmem>>, vector<8x128xf32>
    tpu.vector_store %arg4[%c0_47, %c0_48], %349 {strides = array<i32>} : memref<8x128xf32, #tpu.memory_space<vmem>>, vector<8x128xf32>,
    return
  }
  func.func @transform_0(%arg0: i32) -> (i32, i32) {
    %c0_i32 = arith.constant 0 : i32
    %c0_i32_0 = arith.constant 0 : i32
    return %arg0, %c0_i32 : i32, i32
  }
  func.func @transform_1(%arg0: i32) -> (i32, i32) {
    %c0_i32 = arith.constant 0 : i32
    %c0_i32_0 = arith.constant 0 : i32
    %c0_i32_1 = arith.constant 0 : i32
    return %c0_i32, %c0_i32_0 : i32, i32
  }
  func.func @transform_2(%arg0: i32) -> (i32, i32) {
    %c0_i32 = arith.constant 0 : i32
    %c0_i32_0 = arith.constant 0 : i32
    return %arg0, %c0_i32 : i32, i32
  }
  func.func @transform_3(%arg0: i32) -> (i32, i32) {
    %c0_i32 = arith.constant 0 : i32
    %c0_i32_0 = arith.constant 0 : i32
    return %arg0, %c0_i32 : i32, i32
  }
  func.func @transform_4(%arg0: i32) -> (i32, i32) {
    %c0_i32 = arith.constant 0 : i32
    %c0_i32_0 = arith.constant 0 : i32
    return %arg0, %c0_i32 : i32, i32
  }
}

module attributes {stable_mosaic.version = 11 : i64} {
  func.func @_stats_partials_kernel(%arg0: i32, %arg1: memref<1xf32, #tpu.memory_space<smem>>, %arg2: memref<8x8xf32, #tpu.memory_space<vmem>>, %arg3: memref<8x128xf32, #tpu.memory_space<vmem>>) attributes {dimension_semantics = [#tpu.dimension_semantics<parallel>], iteration_bounds = array<i64: 1>, scalar_prefetch = 0 : i64, scratch_operands = 0 : i64, tpu.core_type = #tpu.core_type<tc>, window_params = [{transform_indices = @transform_0, window_bounds = array<i64: 1>}, {transform_indices = @transform_1, window_bounds = array<i64: 8, 8>}, {transform_indices = @transform_2, window_bounds = array<i64: 8, 128>}]} {
    %c0 = arith.constant 0 : index
    %0 = memref.load %arg1[%c0] : memref<1xf32, #tpu.memory_space<smem>>
    %c0_0 = arith.constant 0 : index
    %c0_1 = arith.constant 0 : index
    %1 = vector.load %arg2[%c0_0, %c0_1] : memref<8x8xf32, #tpu.memory_space<vmem>>, vector<8x8xf32>
    %2 = vector.broadcast %0 : f32 to vector<8x8xf32>
    %3 = arith.subf %1, %2 : vector<8x8xf32>
    %4 = arith.negf %3 : vector<8x8xf32>
    %5 = math.exp %4 : vector<8x8xf32>
    %cst = arith.constant 1.000000e+00 : f32
    %6 = vector.broadcast %cst : f32 to vector<8x8xf32>
    %7 = arith.addf %6, %5 : vector<8x8xf32>
    %8 = arith.divf %6, %7 : vector<8x8xf32>
    %9 = vector.shape_cast %8 : vector<8x8xf32> to vector<1x8x8xf32>
    %cst_2 = arith.constant dense<0.000000e+00> : vector<1xf32>
    %10 = vector.multi_reduction <add>, %9, %cst_2 [1, 2] : vector<1x8x8xf32> to vector<1xf32>
    %11 = vector.shape_cast %10 : vector<1xf32> to vector<1x1x1xf32>
    %12 = vector.extract %11[0, 0, 0] : f32 from vector<1x1x1xf32>
    %cst_3 = arith.constant 0.000000e+00 : f32
    %13 = vector.broadcast %cst_3 : f32 to vector<8x8xf32>
    %14 = arith.cmpf ogt, %3, %13 : vector<8x8xf32>
    %15 = arith.extui %14 : vector<8x8xi1> to vector<8x8xi32>
    %16 = arith.sitofp %15 : vector<8x8xi32> to vector<8x8xf32>
    %17 = vector.shape_cast %16 : vector<8x8xf32> to vector<1x8x8xf32>
    %cst_4 = arith.constant dense<0.000000e+00> : vector<1xf32>
    %18 = vector.multi_reduction <add>, %17, %cst_4 [1, 2] : vector<1x8x8xf32> to vector<1xf32>
    %19 = vector.shape_cast %18 : vector<1xf32> to vector<1x1x1xf32>
    %20 = vector.extract %19[0, 0, 0] : f32 from vector<1x1x1xf32>
    %21 = tpu.iota {dimensions = array<i32: 1>} : vector<8x128xi32>
    %c0_i32 = arith.constant 0 : i32
    %22 = vector.broadcast %c0_i32 : i32 to vector<8x128xi32>
    %23 = arith.cmpi eq, %21, %22 : vector<8x128xi32>
    %c1_i32 = arith.constant 1 : i32
    %24 = vector.broadcast %c1_i32 : i32 to vector<8x128xi32>
    %25 = arith.cmpi eq, %21, %24 : vector<8x128xi32>
    %cst_5 = arith.constant 0.000000e+00 : f32
    %26 = vector.broadcast %20 : f32 to vector<8x128xf32>
    %27 = vector.broadcast %cst_5 : f32 to vector<8x128xf32>
    %28 = arith.select %25, %26, %27 : vector<8x128xi1>, vector<8x128xf32>
    %29 = vector.broadcast %12 : f32 to vector<8x128xf32>
    %30 = arith.select %23, %29, %28 : vector<8x128xi1>, vector<8x128xf32>
    %c0_6 = arith.constant 0 : index
    %c0_7 = arith.constant 0 : index
    %31 = vector.load %arg3[%c0_6, %c0_7] : memref<8x128xf32, #tpu.memory_space<vmem>>, vector<8x128xf32>
    tpu.vector_store %arg3[%c0_6, %c0_7], %30 {strides = array<i32>} : memref<8x128xf32, #tpu.memory_space<vmem>>, vector<8x128xf32>,
    return
  }
  func.func @transform_0(%arg0: i32) -> i32 {
    %c0_i32 = arith.constant 0 : i32
    %c0_i32_0 = arith.constant 0 : i32
    return %c0_i32 : i32
  }
  func.func @transform_1(%arg0: i32) -> (i32, i32) {
    %c0_i32 = arith.constant 0 : i32
    %c0_i32_0 = arith.constant 0 : i32
    return %arg0, %c0_i32 : i32, i32
  }
  func.func @transform_2(%arg0: i32) -> (i32, i32) {
    %c0_i32 = arith.constant 0 : i32
    %c0_i32_0 = arith.constant 0 : i32
    return %arg0, %c0_i32 : i32, i32
  }
}

</mosaic_0001>

<bundles_post_ra>
// kernel: likelihood_ratio_estimator.3
= control target key start
LH: loop header
LB: loop body
LE: loop exit
PB: predicated region body
PF: predicated region fallthrough
CT: control target
= control target key end

     0   :  { %vm22_vm1 = vcmask 64512   ;;  %v70_v7 = vmov 0.0   ;;  %v46_v25 = vlaneseq  ;;  %s95_s0 = inlined_call_operand.<no memory space> [shape: f32[1], index: 0, kind: input, shape index: {}]   ;;  %s96_s1 = inlined_call_operand.vmem [shape: f32[8,8], index: 1, kind: input, shape index: {}]   ;;  %s97_s2 = inlined_call_operand.vmem [shape: f32[8,128], index: 2, kind: output, shape index: {}]  }
   0x1   :  { %v13_v0 = vld [vmem:[%s96_s1] sm:$0xff]  ;;  %v14_v1 = vstv %s95_s0 }
   0x2   :  { %v15_v2 = vsub.f32 %v13_v0, %v14_v1  ;;  %v47_v26 = vand.u32 127, %v46_v25 }
   0x4   :  { %v59_v3 = vmul.f32 -1.442695, %v15_v2  ;;  %vm33_vm0 = vcmp.gt.f32.partialorder %v15_v2, 0.0  ;;  %vm49_vm2 = vcmp.eq.s32.totalorder %v47_v26, 1  ;;  %vm48_vm3 = vcmp.eq.s32.totalorder %v47_v26, 0 }
   0x5   :  { %v60_v8 = vsel %vm33_vm0, 1.0, %v70_v7 }
   0x6   :  { %66 = vpow2.f32 %v59_v3  ;;  %v36_v10 = vsel %vm22_vm1, %v60_v8, 0.0 }
  0x10   :  { %v67_v4 = vpop.eup %66 }
  0x11   :  { %v19_v5 = vadd.f32 1.0, %v67_v4 }
  0x13   :  { %68 = vrcp.f32 %v19_v5 }
  0x1d   :  { %v69_v6 = vpop.eup %68 }
  0x1e   :  { %v23_v9 = vsel %vm22_vm1, %v69_v6, 0.0 }
  0x1f   :  { %24 = vadd.xlane.f32.xlu0 %v23_v9 }
  0x23   :  { %37 = vadd.xlane.f32.xlu0 %v36_v10 }
  0xac   :  { %v25_v11 = vpop.xlane.xlu0 %24 }
  0xad   :  { %v26_v12 = vrot.slane %v25_v11, 4 }
  0xaf   :  { %v27_v13 = vadd.f32 %v26_v12, %v25_v11 }
  0xb0   :  { %v38_v14 = vpop.xlane.xlu0 %37 }
  0xb1   :  { %v28_v15 = vrot.slane %v27_v13, 2  ;;  %v39_v16 = vrot.slane %v38_v14, 4 }
  0xb3   :  { %v40_v17 = vadd.f32 %v39_v16, %v38_v14  ;;  %v29_v18 = vadd.f32 %v28_v15, %v27_v13 }
  0xb5   :  { %v41_v19 = vrot.slane %v40_v17, 2  ;;  %v30_v20 = vrot.slane %v29_v18, 1 }
  0xb7   :  { %v42_v21 = vadd.f32 %v41_v19, %v40_v17  ;;  %v31_v22 = vadd.f32 %v30_v20, %v29_v18 }
  0xb9   :  { %61 = vpush %v31_v22  ;;  %v43_v23 = vrot.slane %v42_v21, 1 }
  0xbb   :  { %v44_v24 = vadd.f32 %v43_v23, %v42_v21 }
  0xbd   :  { %63 = vpush %v44_v24 }
  0xea   :  { %s62_s0 = spop %61 }
  0xeb   :  { %v52_v28 = vstv %s62_s0 }
  0xee   :  { %s64_s1 = spop %63 }
  0xef   :  { %v50_v27 = vstv %s64_s1 }
  0xf0   :  { %v51_v29 = vsel %vm49_vm2, %v50_v27, 0.0 }
  0xf1   :  { %v53_v30 = vsel %vm48_vm3, %v52_v28, %v51_v29 }
  0xf2   :  { %54 = vst [vmem:[%s97_s2] sm:$0xff] %v53_v30 }

// kernel: likelihood_ratio_estimator.2
= control target key start
LH: loop header
LB: loop body
LE: loop exit
PB: predicated region body
PF: predicated region fallthrough
CT: control target
= control target key end

     0   :  { %v596_v0 = vmov 2   ;;  %v597_v1 = vmov 0   ;;  %v598_v3 = vmov 4   ;;  %v599_v4 = vmov 1   ;;  %s866_s0 = inlined_call_operand.vmem [shape: f32[8,32], index: 0, kind: input, shape index: {}]   ;;  %s867_s1 = inlined_call_operand.vmem [shape: f32[32,8], index: 1, kind: input, shape index: {}]   ;;  %s868_s2 = inlined_call_operand.vmem [shape: f32[8,8], index: 2, kind: output, shape index: {0}]   ;;  %s869_s4 = inlined_call_operand.vmem [shape: f32[8,1], index: 4, kind: output, shape index: {2}]   ;;  %s870_s3 = inlined_call_operand.vmem [shape: f32[8,128], index: 3, kind: output, shape index: {1}]  }
   0x1   :  { %547 = vset.pattern.permute.xlu1 %v596_v0  ;;  %545 = vset.pattern.permute.xlu0 %v597_v1  ;;  %v656_v2 = vld [vmem:[%s866_s0] sm:$0xff]  ;;  %v600_v5 = vmov 5   ;;  %v601_v6 = vmov 3   ;;  %v602_v7 = vmov 6   ;;  %v603_v8 = vmov 9  }
   0x2   :  { %48 = vperm.xlu1 %547, %v656_v2   ;;  %25 = vperm.xlu0 %545, %v656_v2   ;;  %v604_v9 = vmov 8   ;;  %v605_v10 = vmov 12   ;;  %v606_v11 = vmov 7   ;;  %v607_v12 = vmov 14   ;;  %v714_v50 = vld [vmem:[%s867_s1] sm:$0xff] }
   0x3   :  { %v608_v13 = vmov 10   ;;  %v609_v14 = vmov 15   ;;  %v610_v15 = vmov 13   ;;  %v611_v16 = vmov 21  }
   0x4   :  { %v612_v17 = vmov 11   ;;  %v613_v18 = vmov 24   ;;  %v614_v19 = vmov 16   ;;  %v615_v20 = vmov 26  }
   0x5   :  { %v616_v21 = vmov 17   ;;  %v617_v22 = vmov 27   ;;  %v618_v23 = vmov 18   ;;  %v619_v24 = vmov 31  }
   0x6   :  { %548 = vset.pattern.permute.xlu1 %v598_v3  ;;  %546 = vset.pattern.permute.xlu0 %v599_v4  ;;  %v620_v25 = vmov 20   ;;  %v621_v26 = vmov 19   ;;  %v622_v27 = vmov 22   ;;  %v623_v28 = vmov 25  }
   0x7   :  { %75 = vperm.xlu1 %548, %v656_v2   ;;  %36 = vperm.xlu0 %546, %v656_v2   ;;  %v624_v29 = vmov 23   ;;  %v625_v30 = vmov 28   ;;  %v626_v31 = vmov 29   ;;  %v627_v32 = vmov 30  }
   0x8   :  { %v19_v42 = vlaneseq  ;;  %vm420_vm0 = vcmask 64512   ;;  %vm469_vm2 = vcmask 7168  }
   0xa   :  { %v701_v45 = vshrl.u32 %v19_v42, 7 }
   0xb   :  { %549 = vset.pattern.permute.xlu1 %v600_v5  ;;  %550 = vset.pattern.permute.xlu0 %v601_v6  ;;  %v748_v6 = vld [vmem:[%s867_s1 + $0x8] sm:$0xff] }
   0xc   :  { %86 = vperm.xlu1 %549, %v656_v2   ;;  %60 = vperm.xlu0 %550, %v656_v2   ;;  %v704_v46 = vsub.s32 0, %v701_v45  ;;  %v707_v47 = vsub.s32 1, %v701_v45  ;;  %v723_v55 = vsub.s32 2, %v701_v45  ;;  %v726_v58 = vsub.s32 3, %v701_v45 }
   0xd   :  { %v731_v61 = vsub.s32 5, %v701_v45  ;;  %v736_v63 = vsub.s32 4, %v701_v45  ;;  %v741_v3 = vsub.s32 6, %v701_v45 }
   0xe   :  { %v22_v51 = vrot.slane %v714_v50, %v704_v46  ;;  %v34_v52 = vrot.slane %v714_v50, %v707_v47  ;;  %v46_v60 = vrot.slane %v714_v50, %v723_v55 }
   0xf   :  { %v84_v5 = vrot.slane %v714_v50, %v731_v61 }
  0x10   :  { %551 = vset.pattern.permute.xlu1 %v602_v7  ;;  %553 = vset.pattern.permute.xlu0 %v603_v8  ;;  %v751_v7 = vsub.s32 7, %v701_v45 }
  0x11   :  { %98 = vperm.xlu1 %551, %v656_v2   ;;  %136 = vperm.xlu0 %553, %v656_v2  }
  0x15   :  { %552 = vset.pattern.permute.xlu1 %v604_v9  ;;  %556 = vset.pattern.permute.xlu0 %v605_v10  ;;  %v73_v9 = vrot.slane %v714_v50, %v736_v63 }
  0x16   :  { %125 = vperm.xlu1 %552, %v656_v2   ;;  %175 = vperm.xlu0 %556, %v656_v2  }
  0x1a   :  { %554 = vset.pattern.permute.xlu1 %v606_v11  ;;  %559 = vset.pattern.permute.xlu0 %v607_v12 }
  0x1b   :  { %110 = vperm.xlu1 %554, %v656_v2   ;;  %198 = vperm.xlu0 %559, %v656_v2  }
  0x1f   :  { %555 = vset.pattern.permute.xlu1 %v608_v13  ;;  %562 = vset.pattern.permute.xlu0 %v609_v14  ;;  %v96_v14 = vrot.slane %v714_v50, %v741_v3 }
  0x20   :  { %148 = vperm.xlu1 %555, %v656_v2   ;;  %210 = vperm.xlu0 %562, %v656_v2  }
  0x24   :  { %557 = vset.pattern.permute.xlu1 %v610_v15  ;;  %565 = vset.pattern.permute.xlu0 %v611_v16  ;;  %v123_v15 = vrot.slane %v748_v6, %v704_v46 }
  0x25   :  { %186 = vperm.xlu1 %557, %v656_v2   ;;  %286 = vperm.xlu0 %565, %v656_v2  }
  0x29   :  { %558 = vset.pattern.permute.xlu1 %v612_v17  ;;  %568 = vset.pattern.permute.xlu0 %v613_v18  ;;  %v134_v18 = vrot.slane %v748_v6, %v707_v47 }
  0x2a   :  { %160 = vperm.xlu1 %558, %v656_v2   ;;  %325 = vperm.xlu0 %568, %v656_v2  }
  0x2e   :  { %560 = vset.pattern.permute.xlu1 %v614_v19  ;;  %571 = vset.pattern.permute.xlu0 %v615_v20  ;;  %v108_v19 = vrot.slane %v714_v50, %v751_v7  ;;  %v768_v20 = vld [vmem:[%s867_s1 + $0x10] sm:$0xff] }
  0x2f   :  { %225 = vperm.xlu1 %560, %v656_v2   ;;  %348 = vperm.xlu0 %571, %v656_v2  }
  0x33   :  { %561 = vset.pattern.permute.xlu1 %v616_v21  ;;  %574 = vset.pattern.permute.xlu0 %v617_v22  ;;  %v146_v22 = vrot.slane %v748_v6, %v723_v55 }
  0x34   :  { %236 = vperm.xlu1 %561, %v656_v2   ;;  %360 = vperm.xlu0 %574, %v656_v2  }
  0x38   :  { %563 = vset.pattern.permute.xlu1 %v618_v23  ;;  %577 = vset.pattern.permute.xlu0 %v619_v24  ;;  %v173_v23 = vrot.slane %v748_v6, %v736_v63 }
  0x39   :  { %248 = vperm.xlu1 %563, %v656_v2  }
  0x3d   :  { %564 = vset.pattern.permute.xlu1 %v620_v25 }
  0x3e   :  { %275 = vperm.xlu1 %564, %v656_v2  }
  0x42   :  { %566 = vset.pattern.permute.xlu1 %v621_v26 }
  0x43   :  { %260 = vperm.xlu1 %566, %v656_v2  }
  0x47   :  { %567 = vset.pattern.permute.xlu1 %v622_v27 }
  0x48   :  { %298 = vperm.xlu1 %567, %v656_v2  }
  0x4c   :  { %569 = vset.pattern.permute.xlu1 %v623_v28  ;;  %v196_v28 = vrot.slane %v748_v6, %v741_v3 }
  0x4d   :  { %336 = vperm.xlu1 %569, %v656_v2  }
  0x51   :  { %570 = vset.pattern.permute.xlu1 %v624_v29 }
  0x52   :  { %310 = vperm.xlu1 %570, %v656_v2  }
  0x56   :  { %572 = vset.pattern.permute.xlu1 %v625_v30 }
  0x57   :  { %375 = vperm.xlu1 %572, %v656_v2  }
  0x5b   :  { %573 = vset.pattern.permute.xlu1 %v626_v31  ;;  %v208_v31 = vrot.slane %v748_v6, %v751_v7 }
  0x5c   :  { %386 = vperm.xlu1 %573, %v656_v2  }
  0x60   :  { %575 = vset.pattern.permute.xlu1 %v627_v32  ;;  %v158_v32 = vrot.slane %v748_v6, %v726_v58 }
  0x61   :  { %398 = vperm.xlu1 %575, %v656_v2  }
  0x65   :  { %576 = vset.pattern.permute.xlu1 %v619_v24  ;;  %v184_v24 = vrot.slane %v748_v6, %v731_v61 }
  0x66   :  { %410 = vperm.xlu1 %576, %v656_v2   ;;  %v58_v2 = vrot.slane %v714_v50, %v726_v58 }
  0x81   :  { %v49_v33 = vpop.permute.xlu1 %48  ;;  %v26_v40 = vpop.permute.xlu0 %25 }
  0x82   :  { %v28_v56 = vsub.f32 %v22_v51, %v26_v40  ;;  %v51_v4 = vsub.f32 %v46_v60, %v49_v33  ;;  %v223_v33 = vrot.slane %v768_v20, %v704_v46  ;;  %v246_v51 = vrot.slane %v768_v20, %v723_v55 }
  0x84   :  { %v29_v0 = vmul.f32 %v28_v56, %v28_v56  ;;  %v52_v16 = vmul.f32 %v51_v4, %v51_v4  ;;  %v284_v56 = vrot.slane %v768_v20, %v731_v61  ;;  %v296_v4 = vrot.slane %v768_v20, %v741_v3 }
  0x86   :  { %v76_v34 = vpop.permute.xlu1 %75  ;;  %v37_v43 = vpop.permute.xlu0 %36  ;;  %v30_v11 = vadd.f32 1.0, %v29_v0 }
  0x87   :  { %v39_v57 = vsub.f32 %v34_v52, %v37_v43  ;;  %v78_v21 = vsub.f32 %v73_v9, %v76_v34  ;;  %v234_v34 = vrot.slane %v768_v20, %v707_v47  ;;  %v273_v52 = vrot.slane %v768_v20, %v736_v63 }
  0x89   :  { %v40_v1 = vmul.f32 %v39_v57, %v39_v57  ;;  %v79_v50 = vmul.f32 %v78_v21, %v78_v21 }
  0x8b   :  { %v87_v35 = vpop.permute.xlu1 %86  ;;  %v61_v48 = vpop.permute.xlu0 %60  ;;  %v41_v12 = vadd.f32 1.0, %v40_v1 }
  0x8c   :  { %v63_v13 = vsub.f32 %v58_v2, %v61_v48  ;;  %v89_v17 = vsub.f32 %v84_v5, %v87_v35  ;;  %v53_v35 = vadd.f32 1.0, %v52_v16  ;;  %v792_v48 = vld [vmem:[%s867_s1 + $0x18] sm:$0xff]  ;;  %v258_v2 = vrot.slane %v768_v20, %v726_v58 }
  0x8d   :  { %v42_v25 = vmul.f32 %v41_v12, %v30_v11  ;;  %v323_v6 = vrot.slane %v792_v48, %v704_v46  ;;  %v80_v16 = vadd.f32 1.0, %v79_v50 }
  0x8e   :  { %v64_v26 = vmul.f32 %v63_v13, %v63_v13  ;;  %v334_v13 = vrot.slane %v792_v48, %v707_v47 }
  0x8f   :  { %v54_v57 = vmul.f32 %v53_v35, %v42_v25  ;;  %v358_v25 = vrot.slane %v792_v48, %v726_v58  ;;  %v396_v58 = vrot.slane %v792_v48, %v741_v3 }
  0x90   :  { %v99_v36 = vpop.permute.xlu1 %98  ;;  %v137_v53 = vpop.permute.xlu0 %136  ;;  %v65_v60 = vadd.f32 1.0, %v64_v26 }
  0x91   :  { %v101_v27 = vsub.f32 %v96_v14, %v99_v36  ;;  %v90_v36 = vmul.f32 %v89_v17, %v89_v17  ;;  %v139_v43 = vsub.f32 %v134_v18, %v137_v53 }
  0x92   :  { %v66_v17 = vmul.f32 %v65_v60, %v54_v57 }
  0x93   :  { %v102_v0 = vmul.f32 %v101_v27, %v101_v27  ;;  %v91_v9 = vadd.f32 1.0, %v90_v36  ;;  %v140_v12 = vmul.f32 %v139_v43, %v139_v43 }
  0x94   :  { %578 = vlog2.f32 %v66_v17 }
  0x95   :  { %v690_v37 = vpop.permute.xlu1 %125  ;;  %v176_v59 = vpop.permute.xlu0 %175  ;;  %v103_v18 = vadd.f32 1.0, %v102_v0  ;;  %v92_v47 = vmul.f32 %v91_v9, %v80_v16 }
  0x96   :  { %v128_v40 = vsub.f32 %v123_v15, %v690_v37  ;;  %v178_v37 = vsub.f32 %v173_v23, %v176_v59  ;;  %v346_v15 = vrot.slane %v792_v48, %v723_v55  ;;  %v373_v55 = vrot.slane %v792_v48, %v736_v63 }
  0x98   :  { %v129_v11 = vmul.f32 %v128_v40, %v128_v40 }
  0x9a   :  { %v692_v38 = vpop.permute.xlu1 %110  ;;  %v199_v8 = vpop.permute.xlu0 %198 }
  0x9b   :  { %v113_v1 = vsub.f32 %v108_v19, %v692_v38  ;;  %v201_v14 = vsub.f32 %v196_v28, %v199_v8  ;;  %v179_v19 = vmul.f32 %v178_v37, %v178_v37  ;;  %v141_v8 = vadd.f32 1.0, %v140_v12 }
  0x9c   :  { %v384_v28 = vrot.slane %v792_v48, %v731_v61 }
  0x9d   :  { %v114_v46 = vmul.f32 %v113_v1, %v113_v1  ;;  %v202_v27 = vmul.f32 %v201_v14, %v201_v14 }
  0x9f   :  { %v694_v39 = vpop.permute.xlu1 %148  ;;  %v211_v29 = vpop.permute.xlu0 %210  ;;  %v115_v36 = vadd.f32 1.0, %v114_v46 }
  0xa0   :  { %v151_v59 = vsub.f32 %v146_v22, %v694_v39  ;;  %v308_v39 = vrot.slane %v768_v20, %v751_v7  ;;  %v213_v20 = vsub.f32 %v208_v31, %v211_v29 }
  0xa4   :  { %v696_v41 = vpop.permute.xlu1 %186  ;;  %v287_v53 = vpop.permute.xlu0 %286 }
  0xa5   :  { %v189_v38 = vsub.f32 %v184_v24, %v696_v41  ;;  %v130_v41 = vadd.f32 1.0, %v129_v11  ;;  %v152_v24 = vmul.f32 %v151_v59, %v151_v59  ;;  %v289_v43 = vsub.f32 %v284_v56, %v287_v53 }
  0xa6   :  { %v203_v11 = vadd.f32 1.0, %v202_v27  ;;  %v214_v56 = vmul.f32 %v213_v20, %v213_v20 }
  0xa7   :  { %v190_v26 = vmul.f32 %v189_v38, %v189_v38  ;;  %v142_v50 = vmul.f32 %v141_v8, %v130_v41  ;;  %v153_v1 = vadd.f32 1.0, %v152_v24  ;;  %v290_v14 = vmul.f32 %v289_v43, %v289_v43 }
  0xa9   :  { %v698_v44 = vpop.permute.xlu1 %160  ;;  %v326_v21 = vpop.permute.xlu0 %325  ;;  %v191_v9 = vadd.f32 1.0, %v190_v26 }
  0xaa   :  { %v163_v23 = vsub.f32 %v158_v32, %v698_v44  ;;  %v104_v44 = vmul.f32 %v103_v18, %v92_v47  ;;  %v180_v32 = vadd.f32 1.0, %v179_v19  ;;  %v328_v12 = vsub.f32 %v323_v6, %v326_v21 }
  0xac   :  { %v164_v40 = vmul.f32 %v163_v23, %v163_v23  ;;  %v116_v31 = vmul.f32 %v115_v36, %v104_v44  ;;  %v329_v16 = vmul.f32 %v328_v12, %v328_v12 }
  0xae   :  { %v709_v49 = vpop.permute.xlu1 %225  ;;  %v349_v37 = vpop.permute.xlu0 %348  ;;  %v165_v53 = vadd.f32 1.0, %v164_v40  ;;  %580 = vlog2.f32 %v116_v31 }
  0xaf   :  { %v228_v57 = vsub.f32 %v223_v33, %v709_v49  ;;  %v351_v17 = vsub.f32 %v346_v15, %v349_v37 }
  0xb1   :  { %v229_v49 = vmul.f32 %v228_v57, %v228_v57  ;;  %v352_v24 = vmul.f32 %v351_v17, %v351_v17 }
  0xb3   :  { %v720_v54 = vpop.permute.xlu1 %236  ;;  %v361_v46 = vpop.permute.xlu0 %360  ;;  %v230_v23 = vadd.f32 1.0, %v229_v49  ;;  %v353_v57 = vadd.f32 1.0, %v352_v24 }
  0xb4   :  { %v239_v35 = vsub.f32 %v234_v34, %v720_v54  ;;  %v363_v15 = vsub.f32 %v358_v25, %v361_v46 }
  0xb6   :  { %v240_v38 = vmul.f32 %v239_v35, %v239_v35 }
  0xb8   :  { %v733_v62 = vpop.permute.xlu1 %248  ;;  %v241_v18 = vadd.f32 1.0, %v240_v38 }
  0xb9   :  { %v251_v60 = vsub.f32 %v246_v51, %v733_v62 }
  0xba   :  { %v242_v26 = vmul.f32 %v241_v18, %v230_v23 }
  0xbb   :  { %v252_v33 = vmul.f32 %v251_v60, %v251_v60  ;;  %v364_v60 = vmul.f32 %v363_v15, %v363_v15 }
  0xbd   :  { %v755_v10 = vpop.permute.xlu1 %275  ;;  %v253_v47 = vadd.f32 1.0, %v252_v33 }
  0xbe   :  { %v278_v0 = vsub.f32 %v273_v52, %v755_v10  ;;  %v154_v10 = vmul.f32 %v153_v1, %v142_v50  ;;  %v192_v52 = vmul.f32 %v191_v9, %v180_v32 }
  0xbf   :  { %v254_v36 = vmul.f32 %v253_v47, %v242_v26  ;;  %v841_v47 = vand.u32 127, %v19_v42 }
  0xc0   :  { %v279_v62 = vmul.f32 %v278_v0, %v278_v0 }
  0xc1   :  { %vm429_vm1 = vcmp.eq.s32.totalorder %v841_v47, %v701_v45  ;;  %vm484_vm3 = vcmp.eq.s32.totalorder %v841_v47, 3  ;;  %vm483_vm4 = vcmp.eq.s32.totalorder %v841_v47, 2  ;;  %vm482_vm5 = vcmp.eq.s32.totalorder %v841_v47, 1 }
  0xc2   :  { %v778_v30 = vpop.permute.xlu1 %260  ;;  %v280_v41 = vadd.f32 1.0, %v279_v62  ;;  %vm481_vm6 = vcmp.eq.s32.totalorder %v841_v47, 0 }
  0xc3   :  { %v263_v54 = vsub.f32 %v258_v2, %v778_v30  ;;  %v215_v2 = vadd.f32 1.0, %v214_v56 }
  0xc5   :  { %v264_v6 = vmul.f32 %v263_v54, %v263_v54  ;;  %v365_v54 = vadd.f32 1.0, %v364_v60 }
  0xc7   :  { %v299_v5 = vpop.permute.xlu1 %298  ;;  %v265_v27 = vadd.f32 1.0, %v264_v6 }
  0xc8   :  { %v301_v34 = vsub.f32 %v296_v4, %v299_v5  ;;  %v166_v4 = vmul.f32 %v165_v53, %v154_v10  ;;  %v291_v5 = vadd.f32 1.0, %v290_v14 }
  0xc9   :  { %v266_v25 = vmul.f32 %v265_v27, %v254_v36 }
  0xca   :  { %v302_v19 = vmul.f32 %v301_v34, %v301_v34  ;;  %582 = vlog2.f32 %v166_v4  ;;  %v292_v20 = vmul.f32 %v291_v5, %v280_v41 }
  0xcc   :  { %v337_v22 = vpop.permute.xlu1 %336  ;;  %v303_v44 = vadd.f32 1.0, %v302_v19 }
  0xcd   :  { %v339_v29 = vsub.f32 %v334_v13, %v337_v22  ;;  %v579_v13 = vpop.eup %578  ;;  %v330_v22 = vadd.f32 1.0, %v329_v16 }
  0xce   :  { %v304_v0 = vmul.f32 %v303_v44, %v292_v20  ;;  %v68_v56 = vmul.f32 0.6931472, %v579_v13 }
  0xcf   :  { %v340_v21 = vmul.f32 %v339_v29, %v339_v29 }
  0xd0   :  { %v69_v10 = vsub.f32 -36.631355, %v68_v56 }
  0xd1   :  { %v311_v59 = vpop.permute.xlu1 %310  ;;  %v341_v32 = vadd.f32 1.0, %v340_v21 }
  0xd2   :  { %v313_v51 = vsub.f32 %v308_v39, %v311_v59  ;;  %v204_v39 = vmul.f32 %v203_v11, %v192_v52  ;;  %v581_v59 = vpop.eup %580 }
  0xd3   :  { %v342_v37 = vmul.f32 %v341_v32, %v330_v22  ;;  %v118_v33 = vmul.f32 0.6931472, %v581_v59 }
  0xd4   :  { %v314_v8 = vmul.f32 %v313_v51, %v313_v51  ;;  %v216_v50 = vmul.f32 %v215_v2, %v204_v39  ;;  %v583_v31 = vpop.eup %582 }
  0xd5   :  { %v354_v38 = vmul.f32 %v353_v57, %v342_v37  ;;  %v168_v52 = vmul.f32 0.6931472, %v583_v31  ;;  %v119_v17 = vsub.f32 %v69_v10, %v118_v33 }
  0xd6   :  { %v376_v30 = vpop.permute.xlu1 %375  ;;  %v315_v40 = vadd.f32 1.0, %v314_v8  ;;  %584 = vlog2.f32 %v216_v50 }
  0xd7   :  { %v378_v1 = vsub.f32 %v373_v55, %v376_v30  ;;  %586 = vlog2.f32 %v266_v25  ;;  %v366_v55 = vmul.f32 %v365_v54, %v354_v38  ;;  %v169_v19 = vsub.f32 %v119_v17, %v168_v52 }
  0xd8   :  { %v316_v9 = vmul.f32 %v315_v40, %v304_v0 }
  0xd9   :  { %v379_v3 = vmul.f32 %v378_v1, %v378_v1 }
  0xda   :  { %588 = vlog2.f32 %v316_v9 }
  0xdb   :  { %v387_v35 = vpop.permute.xlu1 %386  ;;  %v380_v53 = vadd.f32 1.0, %v379_v3  ;;  %590 = vlog2.f32 %v366_v55 }
  0xdc   :  { %v389_v43 = vsub.f32 %v384_v28, %v387_v35  ;;  %v408_v28 = vrot.slane %v792_v48, %v751_v7 }
  0xde   :  { %v390_v11 = vmul.f32 %v389_v43, %v389_v43 }
  0xe0   :  { %v399_v12 = vpop.permute.xlu1 %398  ;;  %v391_v29 = vadd.f32 1.0, %v390_v11  ;;  %v585_v16 = vpop.eup %584 }
  0xe1   :  { %v401_v61 = vsub.f32 %v396_v58, %v399_v12  ;;  %v587_v18 = vpop.eup %586  ;;  %v218_v46 = vmul.f32 0.6931472, %v585_v16 }
  0xe2   :  { %v392_v62 = vmul.f32 %v391_v29, %v380_v53  ;;  %v268_v30 = vmul.f32 0.6931472, %v587_v18 }
  0xe3   :  { %v402_v34 = vmul.f32 %v401_v61, %v401_v61  ;;  %v219_v2 = vsub.f32 %v169_v19, %v218_v46 }
  0xe4   :  { %v589_v21 = vpop.eup %588 }
  0xe5   :  { %v411_v63 = vpop.permute.xlu1 %410  ;;  %v403_v14 = vadd.f32 1.0, %v402_v34  ;;  %v318_v4 = vmul.f32 0.6931472, %v589_v21  ;;  %v269_v5 = vsub.f32 %v219_v2, %v268_v30  ;;  %v591_v13 = vpop.eup %590 }
  0xe6   :  { %v413_v49 = vsub.f32 %v408_v28, %v411_v63  ;;  %v368_v41 = vmul.f32 0.6931472, %v591_v13 }
  0xe7   :  { %v404_v7 = vmul.f32 %v403_v14, %v392_v62  ;;  %v319_v23 = vsub.f32 %v269_v5, %v318_v4 }
  0xe8   :  { %v414_v51 = vmul.f32 %v413_v49, %v413_v49 }
  0xe9   :  { %v369_v39 = vsub.f32 %v319_v23, %v368_v41 }
  0xea   :  { %v415_v48 = vadd.f32 1.0, %v414_v51 }
  0xec   :  { %v416_v6 = vmul.f32 %v415_v48, %v404_v7 }
  0xee   :  { %592 = vlog2.f32 %v416_v6 }
  0xf8   :  { %v593_v8 = vpop.eup %592 }
  0xf9   :  { %v418_v22 = vmul.f32 0.6931472, %v593_v8 }
  0xfb   :  { %v419_v24 = vsub.f32 %v369_v39, %v418_v22 }
  0xfd   :  { %v465_v15 = vsel %vm429_vm1, %v419_v24, 0.0  ;;  %421 = vst.msk [vmem:[%s868_s2] sm:$0xff] %vm420_vm0, %v419_v24  ;;  %v430_v26 = vsel %vm429_vm1, -inf, %v419_v24  ;;  %v455_v37 = vsel %vm420_vm0, %v419_v24, 0.0 }
  0xfe   :  { %v466_v27 = vsel %vm420_vm0, %v465_v15, 0.0  ;;  %v431_v42 = vsel %vm420_vm0, %v430_v26, -inf }
  0xff   :  { %467 = vadd.xlane.f32.xlu1 %v466_v27  ;;  %432 = vmax.xlane.f32.xlu0 %v431_v42 }
 0x18c   :  { %v468_v44 = vpop.xlane.xlu1 %467  ;;  %v433_v32 = vpop.xlane.xlu0 %432 }
 0x18d   :  { %v434_v35 = vrot.slane %v433_v32, 4  ;;  %v470_v36 = vsel %vm469_vm2, %v468_v44, 0.0  ;;  %480 = vst.msk [vmem:[%s869_s4] sm:$0xff] %vm469_vm2, %v468_v44 }
 0x18e   :  { %471 = vadd.xlane.f32.xlu1 %v470_v36 }
 0x18f   :  { %v435_v45 = vmax.f32 %v433_v32, %v434_v35 }
 0x191   :  { %v436_v20 = vrot.slane %v435_v45, 2 }
 0x193   :  { %v437_v40 = vmax.f32 %v435_v45, %v436_v20 }
 0x195   :  { %v438_v43 = vrot.slane %v437_v40, 1 }
 0x197   :  { %v439_v50 = vmax.f32 %v437_v40, %v438_v43 }
 0x199   :  { %505 = vpush %v439_v50 }
 0x1ca   :  { %s854_s2 = spop %505 }
 0x1cb   :  { %v441_v57 = vstv %s854_s2 }
 0x1cc   :  { %v442_v60 = vsub.f32 %v430_v26, %v441_v57 }
 0x1ce   :  { %v443_v58 = vmul.f32 1.442695, %v442_v60 }
 0x1d0   :  { %594 = vpow2.f32 %v443_v58 }
 0x1da   :  { %v595_v25 = vpop.eup %594 }
 0x1db   :  { %v445_v0 = vsel %vm420_vm0, %v595_v25, 0.0 }
 0x1dc   :  { %446 = vadd.xlane.f32.xlu0 %v445_v0 }
 0x1e0   :  { %456 = vadd.xlane.f32.xlu0 %v455_v37 }
 0x21b   :  { %v472_v1 = vpop.xlane.xlu1 %471 }
 0x21c   :  { %v473_v9 = vrot.slane %v472_v1, 4 }
 0x21e   :  { %v474_v11 = vadd.f32 %v473_v9, %v472_v1 }
 0x220   :  { %v475_v28 = vrot.slane %v474_v11, 2 }
 0x222   :  { %v476_v31 = vadd.f32 %v475_v28, %v474_v11 }
 0x224   :  { %v477_v14 = vrot.slane %v476_v31, 1 }
 0x226   :  { %v478_v62 = vadd.f32 %v477_v14, %v476_v31 }
 0x269   :  { %v447_v12 = vpop.xlane.xlu0 %446 }
 0x26a   :  { %v448_v59 = vrot.slane %v447_v12, 4 }
 0x26c   :  { %v449_v61 = vadd.f32 %v448_v59, %v447_v12 }
 0x26d   :  { %v457_v38 = vpop.xlane.xlu0 %456 }
 0x26e   :  { %v450_v54 = vrot.slane %v449_v61, 2  ;;  %v458_v3 = vrot.slane %v457_v38, 4 }
 0x270   :  { %v459_v34 = vadd.f32 %v458_v3, %v457_v38  ;;  %v451_v29 = vadd.f32 %v450_v54, %v449_v61 }
 0x272   :  { %v460_v56 = vrot.slane %v459_v34, 2  ;;  %v452_v63 = vrot.slane %v451_v29, 1 }
 0x274   :  { %v461_v55 = vadd.f32 %v460_v56, %v459_v34  ;;  %v453_v53 = vadd.f32 %v452_v63, %v451_v29 }
 0x276   :  { %507 = vpush %v453_v53  ;;  %v462_v49 = vrot.slane %v461_v55, 1 }
 0x278   :  { %v463_v33 = vadd.f32 %v462_v49, %v461_v55 }
 0x27a   :  { %509 = vpush %v463_v33 }
 0x27b   :  { %511 = vpush %v478_v62 }
 0x2a7   :  { %s508_s4 = spop %507 }
 0x2a8   :  { %v489_v7 = vstv %s508_s4 }
 0x2ab   :  { %s510_s27 = spop %509 }
 0x2ac   :  { %v487_v51 = vstv %s510_s27  ;;  %s512_s28 = spop %511 }
 0x2ad   :  { %v485_v10 = vstv %s512_s28 }
 0x2ae   :  { %v486_v52 = vsel %vm484_vm3, %v485_v10, 0.0 }
 0x2af   :  { %v488_v48 = vsel %vm483_vm4, %v487_v51, %v486_v52 }
 0x2b0   :  { %v490_v16 = vsel %vm482_vm5, %v489_v7, %v488_v48 }
 0x2b1   :  { %v491_v17 = vsel %vm481_vm6, %v441_v57, %v490_v16 }
 0x2b2   :  { %492 = vst [vmem:[%s870_s3] sm:$0xff] %v491_v17 }

</bundles_post_ra>
